<compile_context>
chip_gen: v7x
topology: tpu7x:2x2x1
jax: 0.10.0
libtpu: 0.0.40
codegen_flags: <defaults>
</compile_context>

<pallas_src>
import functools

import jax
import jax.numpy as jnp
from jax import lax
from jax.experimental import pallas as pl
from jax.experimental.pallas import tpu as pltpu


LANES = 128   # TPU lane width; all weight tiles are padded to this many columns.
ALIGN = 16    # bf16 sublane tile height -> keep every slab section 16-row aligned.


def _round_up(n, m):
    return ((n + m - 1) // m) * m


def _slab_offsets(input_size):
    """Static row offsets of each section inside the packed weight slab."""
    r_b = _round_up(max(input_size, 1), ALIGN)   # b_ih + b_hh row
    r_whh = r_b + ALIGN                          # W_hh^T padded to (128, 128)
    r_wfc = r_whh + LANES                        # W_fc^T padded to (128, 128)
    r_bfc = r_wfc + LANES                        # b_fc row
    total = r_bfc + ALIGN
    return r_b, r_whh, r_wfc, r_bfc, total


def prepare_params(w_ih, w_hh, b_ih, b_hh, w_fc, b_fc):
    """One-time parameter packing. Call ONCE at setup, NOT in the hot path.

    Returns a single bf16 (rows, 128) slab:
      rows [0, I)           : W_ih^T             (I, H)   in cols [0, H)
      row  r_b              : b_ih + b_hh        (H,)     in cols [0, H)
      rows [r_whh, +128)    : W_hh^T zero-padded (128,128)
      rows [r_wfc, +128)    : W_fc^T zero-padded (128,128), valid cols [0, O)
      row  r_bfc            : b_fc               (O,)     in cols [0, O)
    Zero padding keeps the unused lanes of h / the output exactly zero.
    """
    H, I = w_ih.shape
    O = w_fc.shape[0]
    assert H <= LANES and O <= LANES and I <= 1024
    r_b, r_whh, r_wfc, r_bfc, total = _slab_offsets(I)

    slab = jnp.zeros((total, LANES), jnp.float32)
    slab = slab.at[:I, :H].set(w_ih.T)
    slab = slab.at[r_b, :H].set(b_ih + b_hh)
    slab = slab.at[r_whh:r_whh + H, :H].set(w_hh.T)
    slab = slab.at[r_wfc:r_wfc + H, :O].set(w_fc.T)
    slab = slab.at[r_bfc, :O].set(b_fc)
    return slab.astype(jnp.bfloat16)


def _rnn_fc_kernel(x_ref, slab_ref, out_ref, *, r_b, r_whh, r_wfc, r_bfc):
    """Whole RNN recurrence + final FC in one invocation (no grid).

    x_ref    : (S, I)   f32  — inputs of the last batch row, all timesteps
    slab_ref : (R, 128) bf16 — packed weights/biases (see prepare_params)
    out_ref  : (S, 128) f32  — fc output, valid in cols [0, O), zeros elsewhere
    """
    S, _ = x_ref.shape
    L = out_ref.shape[1]                                   # 128

    wih = slab_ref[0:x_ref.shape[1], :]                    # (I, 128) bf16
    brnn = slab_ref[r_b:r_b + 1, :].astype(jnp.float32)    # (1, 128)
    whh = slab_ref[r_whh:r_whh + L, :]                     # (128, 128) bf16
    wfc = slab_ref[r_wfc:r_wfc + L, :]                     # (128, 128) bf16
    bfc = slab_ref[r_bfc:r_bfc + 1, :].astype(jnp.float32)  # (1, 128)

    # Input projection for ALL timesteps in one bf16 MXU pass (off the serial
    # dependency chain), with both RNN biases folded in.  f32 accumulation.
    xw = jnp.dot(x_ref[...].astype(jnp.bfloat16), wih,
                 preferred_element_type=jnp.float32) + brnn          # (S, 128)

    # Serial recurrence, fully unrolled (S tiny & static); h_t stay in vregs.
    # h_1 = tanh(x_1 W_ih^T + b) since h_0 = 0.
    h = jnp.tanh(xw[0:1, :])                                         # (1, 128)
    hs = [h]
    for t in range(1, S):
        pre = xw[t:t + 1, :] + jnp.dot(h.astype(jnp.bfloat16), whh,
                                       preferred_element_type=jnp.float32)
        h = jnp.tanh(pre)            # tanh / adds kept in f32 (v5e EUP has no bf16)
        hs.append(h)

    seq_h = jnp.concatenate(hs, axis=0)                              # (S, 128), vregs

    # Final FC: one bf16 MXU pass; lane-dense (S, 128) unmasked store.
    out_ref[...] = (jnp.dot(seq_h.astype(jnp.bfloat16), wfc,
                            preferred_element_type=jnp.float32) + bfc)


@functools.partial(jax.jit, static_argnames=("output_size",))
def nlp_model_forward(x, slab, output_size):
    """x: (S, B, I) f32; slab: packed params from prepare_params.

    Returns (S, output_size) f32 == fc(rnn(x)[0][:, -1, :]).
    """
    S, B, I = x.shape
    r_b, r_whh, r_wfc, r_bfc, total = _slab_offsets(I)
    assert slab.shape == (total, LANES)

    # Only the last batch row is consumed downstream (seq-first layout).
    x_last = x[:, -1, :]                                             # (S, I)

    kernel = functools.partial(_rnn_fc_kernel,
                               r_b=r_b, r_whh=r_whh, r_wfc=r_wfc, r_bfc=r_bfc)

    flops = 2 * S * I * LANES + 4 * S * LANES * LANES
    bytes_accessed = x_last.size * 4 + slab.size * 2 + S * LANES * 4

    # Total footprint < 100 KB: everything resident in VMEM, no grid, no
    # pipelining needed (well under v7x's 64 MiB VMEM as well).
    out_pad = pl.pallas_call(
        kernel,
        out_shape=jax.ShapeDtypeStruct((S, LANES), jnp.float32),
        in_specs=[pl.BlockSpec(memory_space=pltpu.MemorySpace.VMEM),
                  pl.BlockSpec(memory_space=pltpu.MemorySpace.VMEM)],
        out_specs=pl.BlockSpec(memory_space=pltpu.MemorySpace.VMEM),
        cost_estimate=pl.CostEstimate(flops=flops,
                                      transcendentals=S * LANES,
                                      bytes_accessed=bytes_accessed),
    )(x_last, slab)

    return out_pad[:, :output_size]


def reference_forward(x, w_ih, w_hh, b_ih, b_hh, w_fc, b_fc):
    """Pure-JAX f32 reference matching PyTorch NLPModel.forward semantics."""
    S, B, I = x.shape
    H = w_hh.shape[0]

    def step(h, x_t):
        h_new = jnp.tanh(x_t @ w_ih.T + b_ih + h @ w_hh.T + b_hh)
        return h_new, h_new

    h0 = jnp.zeros((B, H), jnp.float32)
    _, outputs = lax.scan(step, h0, x)        # (S, B, H)
    last_batch = outputs[:, -1, :]            # (S, H)  == output[:, -1, :]
    return last_batch @ w_fc.T + b_fc         # (S, O)


if __name__ == "__main__":
    # Small shapes consistent with the module's forward pass.
    seq_len, batch, input_size, hidden_size, output_size = 8, 2, 16, 32, 8

    key = jax.random.PRNGKey(0)
    keys = jax.random.split(key, 7)
    k = 1.0 / jnp.sqrt(hidden_size)

    x = jax.random.normal(keys[0], (seq_len, batch, input_size), jnp.float32)
    w_ih = jax.random.uniform(keys[1], (hidden_size, input_size), jnp.float32, -k, k)
    w_hh = jax.random.uniform(keys[2], (hidden_size, hidden_size), jnp.float32, -k, k)
    b_ih = jax.random.uniform(keys[3], (hidden_size,), jnp.float32, -k, k)
    b_hh = jax.random.uniform(keys[4], (hidden_size,), jnp.float32, -k, k)
    w_fc = jax.random.uniform(keys[5], (output_size, hidden_size), jnp.float32, -k, k)
    b_fc = jax.random.uniform(keys[6], (output_size,), jnp.float32, -k, k)

    # One-time parameter packing (outside the hot path).
    slab = jax.block_until_ready(prepare_params(w_ih, w_hh, b_ih, b_hh, w_fc, b_fc))

    out = nlp_model_forward(x, slab, output_size=output_size)
    out = jax.block_until_ready(out)

    ref = reference_forward(x, w_ih, w_hh, b_ih, b_hh, w_fc, b_fc)
    assert out.shape == (seq_len, output_size), out.shape
    # Tolerance loosened vs. f32 reference because matmul operands run in bf16
    # (single-pass MXU); observed error is ~1e-2 worst case at these shapes.
    assert jnp.allclose(out, ref, atol=5e-2, rtol=5e-2), jnp.max(jnp.abs(out - ref))

    print("KERNEL_OK")
</pallas_src>

<mosaic_0001>
module attributes {stable_mosaic.version = 11 : i64} {
  func.func @_rnn_fc_kernel(%arg0: memref<8x16xf32, #tpu.memory_space<vmem>>, %arg1: memref<304x128xbf16, #tpu.memory_space<vmem>>, %arg2: memref<8x128xf32, #tpu.memory_space<vmem>>) attributes {dimension_semantics = [], scalar_prefetch = 0 : i64, scratch_operands = 0 : i64, tpu.core_type = #tpu.core_type<tc>} {
    %c0 = arith.constant 0 : index
    %c0_0 = arith.constant 0 : index
    %0 = vector.load %arg1[%c0, %c0_0] : memref<304x128xbf16, #tpu.memory_space<vmem>>, vector<16x128xbf16>
    %c16 = arith.constant 16 : index
    %c0_1 = arith.constant 0 : index
    %1 = vector.load %arg1[%c16, %c0_1] : memref<304x128xbf16, #tpu.memory_space<vmem>>, vector<1x128xbf16>
    %2 = arith.extf %1 : vector<1x128xbf16> to vector<1x128xf32>
    %c32 = arith.constant 32 : index
    %c0_2 = arith.constant 0 : index
    %3 = vector.load %arg1[%c32, %c0_2] : memref<304x128xbf16, #tpu.memory_space<vmem>>, vector<128x128xbf16>
    %c160 = arith.constant 160 : index
    %c0_3 = arith.constant 0 : index
    %4 = vector.load %arg1[%c160, %c0_3] : memref<304x128xbf16, #tpu.memory_space<vmem>>, vector<128x128xbf16>
    %c288 = arith.constant 288 : index
    %c0_4 = arith.constant 0 : index
    %5 = vector.load %arg1[%c288, %c0_4] : memref<304x128xbf16, #tpu.memory_space<vmem>>, vector<1x128xbf16>
    %6 = arith.extf %5 : vector<1x128xbf16> to vector<1x128xf32>
    %c0_5 = arith.constant 0 : index
    %c0_6 = arith.constant 0 : index
    %7 = vector.load %arg0[%c0_5, %c0_6] : memref<8x16xf32, #tpu.memory_space<vmem>>, vector<8x16xf32>
    %8 = arith.truncf %7 : vector<8x16xf32> to vector<8x16xbf16>
    %cst = arith.constant dense<0.000000e+00> : vector<8x128xf32>
    %9 = tpu.matmul %8, %0, %cst {dimension_numbers = #tpu.dot_dimension_numbers<[1], [0], [0], [1], [0, 0, 1, 1], [], []>} : vector<8x16xbf16>, vector<16x128xbf16>, vector<8x128xf32> -> vector<8x128xf32>
    %10 = vector.broadcast %2 : vector<1x128xf32> to vector<8x128xf32>
    %11 = arith.addf %9, %10 : vector<8x128xf32>
    %12 = vector.extract_strided_slice %11 {offsets = [0, 0], sizes = [1, 128], strides = [1, 1]} : vector<8x128xf32> to vector<1x128xf32>
    %13 = math.tanh %12 : vector<1x128xf32>
    %14 = vector.extract_strided_slice %11 {offsets = [1, 0], sizes = [1, 128], strides = [1, 1]} : vector<8x128xf32> to vector<1x128xf32>
    %15 = arith.truncf %13 : vector<1x128xf32> to vector<1x128xbf16>
    %cst_7 = arith.constant dense<0.000000e+00> : vector<1x128xf32>
    %16 = tpu.matmul %15, %3, %cst_7 {dimension_numbers = #tpu.dot_dimension_numbers<[1], [0], [0], [1], [0, 0, 1, 1], [], []>} : vector<1x128xbf16>, vector<128x128xbf16>, vector<1x128xf32> -> vector<1x128xf32>
    %17 = arith.addf %14, %16 : vector<1x128xf32>
    %18 = math.tanh %17 : vector<1x128xf32>
    %19 = vector.extract_strided_slice %11 {offsets = [2, 0], sizes = [1, 128], strides = [1, 1]} : vector<8x128xf32> to vector<1x128xf32>
    %20 = arith.truncf %18 : vector<1x128xf32> to vector<1x128xbf16>
    %cst_8 = arith.constant dense<0.000000e+00> : vector<1x128xf32>
    %21 = tpu.matmul %20, %3, %cst_8 {dimension_numbers = #tpu.dot_dimension_numbers<[1], [0], [0], [1], [0, 0, 1, 1], [], []>} : vector<1x128xbf16>, vector<128x128xbf16>, vector<1x128xf32> -> vector<1x128xf32>
    %22 = arith.addf %19, %21 : vector<1x128xf32>
    %23 = math.tanh %22 : vector<1x128xf32>
    %24 = vector.extract_strided_slice %11 {offsets = [3, 0], sizes = [1, 128], strides = [1, 1]} : vector<8x128xf32> to vector<1x128xf32>
    %25 = arith.truncf %23 : vector<1x128xf32> to vector<1x128xbf16>
    %cst_9 = arith.constant dense<0.000000e+00> : vector<1x128xf32>
    %26 = tpu.matmul %25, %3, %cst_9 {dimension_numbers = #tpu.dot_dimension_numbers<[1], [0], [0], [1], [0, 0, 1, 1], [], []>} : vector<1x128xbf16>, vector<128x128xbf16>, vector<1x128xf32> -> vector<1x128xf32>
    %27 = arith.addf %24, %26 : vector<1x128xf32>
    %28 = math.tanh %27 : vector<1x128xf32>
    %29 = vector.extract_strided_slice %11 {offsets = [4, 0], sizes = [1, 128], strides = [1, 1]} : vector<8x128xf32> to vector<1x128xf32>
    %30 = arith.truncf %28 : vector<1x128xf32> to vector<1x128xbf16>
    %cst_10 = arith.constant dense<0.000000e+00> : vector<1x128xf32>
    %31 = tpu.matmul %30, %3, %cst_10 {dimension_numbers = #tpu.dot_dimension_numbers<[1], [0], [0], [1], [0, 0, 1, 1], [], []>} : vector<1x128xbf16>, vector<128x128xbf16>, vector<1x128xf32> -> vector<1x128xf32>
    %32 = arith.addf %29, %31 : vector<1x128xf32>
    %33 = math.tanh %32 : vector<1x128xf32>
    %34 = vector.extract_strided_slice %11 {offsets = [5, 0], sizes = [1, 128], strides = [1, 1]} : vector<8x128xf32> to vector<1x128xf32>
    %35 = arith.truncf %33 : vector<1x128xf32> to vector<1x128xbf16>
    %cst_11 = arith.constant dense<0.000000e+00> : vector<1x128xf32>
    %36 = tpu.matmul %35, %3, %cst_11 {dimension_numbers = #tpu.dot_dimension_numbers<[1], [0], [0], [1], [0, 0, 1, 1], [], []>} : vector<1x128xbf16>, vector<128x128xbf16>, vector<1x128xf32> -> vector<1x128xf32>
    %37 = arith.addf %34, %36 : vector<1x128xf32>
    %38 = math.tanh %37 : vector<1x128xf32>
    %39 = vector.extract_strided_slice %11 {offsets = [6, 0], sizes = [1, 128], strides = [1, 1]} : vector<8x128xf32> to vector<1x128xf32>
    %40 = arith.truncf %38 : vector<1x128xf32> to vector<1x128xbf16>
    %cst_12 = arith.constant dense<0.000000e+00> : vector<1x128xf32>
    %41 = tpu.matmul %40, %3, %cst_12 {dimension_numbers = #tpu.dot_dimension_numbers<[1], [0], [0], [1], [0, 0, 1, 1], [], []>} : vector<1x128xbf16>, vector<128x128xbf16>, vector<1x128xf32> -> vector<1x128xf32>
    %42 = arith.addf %39, %41 : vector<1x128xf32>
    %43 = math.tanh %42 : vector<1x128xf32>
    %44 = vector.extract_strided_slice %11 {offsets = [7, 0], sizes = [1, 128], strides = [1, 1]} : vector<8x128xf32> to vector<1x128xf32>
    %45 = arith.truncf %43 : vector<1x128xf32> to vector<1x128xbf16>
    %cst_13 = arith.constant dense<0.000000e+00> : vector<1x128xf32>
    %46 = tpu.matmul %45, %3, %cst_13 {dimension_numbers = #tpu.dot_dimension_numbers<[1], [0], [0], [1], [0, 0, 1, 1], [], []>} : vector<1x128xbf16>, vector<128x128xbf16>, vector<1x128xf32> -> vector<1x128xf32>
    %47 = arith.addf %44, %46 : vector<1x128xf32>
    %48 = math.tanh %47 : vector<1x128xf32>
    %49 = tpu.concatenate %13, %18, %23, %28, %33, %38, %43, %48 in 0 : vector<1x128xf32>, vector<1x128xf32>, vector<1x128xf32>, vector<1x128xf32>, vector<1x128xf32>, vector<1x128xf32>, vector<1x128xf32>, vector<1x128xf32> -> vector<8x128xf32>
    %50 = arith.truncf %49 : vector<8x128xf32> to vector<8x128xbf16>
    %cst_14 = arith.constant dense<0.000000e+00> : vector<8x128xf32>
    %51 = tpu.matmul %50, %4, %cst_14 {dimension_numbers = #tpu.dot_dimension_numbers<[1], [0], [0], [1], [0, 0, 1, 1], [], []>} : vector<8x128xbf16>, vector<128x128xbf16>, vector<8x128xf32> -> vector<8x128xf32>
    %52 = vector.broadcast %6 : vector<1x128xf32> to vector<8x128xf32>
    %53 = arith.addf %51, %52 : vector<8x128xf32>
    %c0_15 = arith.constant 0 : index
    %c0_16 = arith.constant 0 : index
    %54 = vector.load %arg2[%c0_15, %c0_16] : memref<8x128xf32, #tpu.memory_space<vmem>>, vector<8x128xf32>
    tpu.vector_store %arg2[%c0_15, %c0_16], %53 {strides = array<i32>} : memref<8x128xf32, #tpu.memory_space<vmem>>, vector<8x128xf32>,
    return
  }
}

</mosaic_0001>

<bundles_post_ra>
// kernel: nlp_model_forward.1
= control target key start
LH: loop header
LB: loop body
LE: loop exit
PB: predicated region body
PF: predicated region fallthrough
CT: control target
= control target key end

     0   :  { %7 = vsyncpa [#allocation3], 0  ;;  %s1203_s0 = inlined_call_operand.vmem [shape: f32[8,16], index: 0, kind: input, shape index: {}]   ;;  %s1204_s1 = inlined_call_operand.hbm [shape: bf16[304,128], index: 1, kind: input, shape index: {}]   ;;  %s1205_s2 = inlined_call_operand.hbm [shape: f32[8,128], index: 2, kind: output, shape index: {}]  }
   0x1   :  { %8 = vsyncpa [#allocation4], 0  ;;  %s983_s9 = smov [#allocation2]   ;;  %s935_s13 = scalar_lea.hbm %s1204_s1, 2432 }
   0x2   :  { %s16_s10 = sshll.u32 %s983_s9, 4  ;;  %p936_p0 = scmp.ne.s32.totalorder %s1204_s1, %s935_s13  ;;  %s17_s10 = int_to_ptr.vmem [resolvable:$true] %s16_s10 }
   0x3   :  { %p939_p1 = scmp.lt.u32.totalorder %s935_s13, %s1204_s1 }
   0x5   :  { %p941_p2 = pnand %p939_p1, %p936_p0 }
   0x7   :  { %944 = shalt.err (!%p941_p2)
}
   0x8   :  { %s945_s18 = scalar_lea.vmem %s17_s10, 2432  ;;  %p950_p4 = scmp.lt.s32.totalorder %s17_s10, %s17_s10 }
   0x9   :  { %p946_p3 = scmp.ne.s32.totalorder %s17_s10, %s945_s18  ;;  %p951_p5 = scmp.lt.s32.totalorder %s945_s18, %s945_s18 }
   0xb   :  { %p952_p6 = por %p951_p5, %p950_p4 }
   0xd   :  { %p953_p7 = pnand %p952_p6, %p946_p3 }
   0xf   :  { %956 = shalt.err (!%p953_p7)
}
  0x10   :  { %s984_s19 = smov 64   ;;  %s985_s20 = smov 4  }
  0x11   :  { %22 = dma.hbm_to_vmem [thread:$0]  %s1204_s1, 2432, %s17_s10, [#allocation3], %s984_s19, %s984_s19, %s985_s20  }
  0x12   :  { %979 = dma.done.wait [#allocation3], 2432  }
  0x13   :  { %980 = vsyncadd [#allocation3], 4294964864  ;;  %v986_v0 = vmov 0.0   ;;  %vm987_vm0 = vmmov 0   ;;  %v902_v1 = vld [vmem:[#allocation2] sm:$0xff]   ;;  %vm77_vm1 = vcmask 130048   ;;  %v67_v12 = vlaneseq }
  0x14   :  { %730 = vmatprep.subr.bf16.mxu0 %v986_v0  ;;  %732 = vmatprep.mubr.msk.bf16.mxu0 %vm987_vm0, %v986_v0  ;;  %v65_v2 = vld [vmem:[%s1203_s0] sm:$0xff]  ;;  %v1025_v4 = vld [vmem:[#allocation2 + $0x10] sm:$0xff]   ;;  %v1029_v5 = vld [vmem:[#allocation2 + $0x18] sm:$0xff]   ;;  %vm515_vm2 = vcmask 1040384   ;;  %vm517_vm3 = vcmask 1041408   ;;  %vm519_vm4 = vcmask 1042432  }
  0x15   :  { %736 = vmatprep.subr.bf16.mxu1 %v986_v0  ;;  %752 = vmatprep.mubr.msk.bf16.mxu1 %vm987_vm0, %v986_v0  ;;  %v66_v3 = vpack.c.bf16 %v65_v2, %v65_v2  ;;  %v1032_v6 = vld [vmem:[#allocation2 + $0x20] sm:$0xff]   ;;  %v1040_v7 = vld [vmem:[#allocation2 + $0x28] sm:$0xff]   ;;  %v1052_v8 = vld [vmem:[#allocation2 + $0x30] sm:$0xff]   ;;  %v1076_v13 = vshrl.u32 %v67_v12, 7  ;;  %vm521_vm5 = vcmask 1043456   ;;  %vm523_vm6 = vcmask 1044480  }
  0x16   :  { %731 = vmatpush3.bf16.msra.mxu0 %v902_v1  ;;  %737 = vmatpush3.bf16.msra.mxu1 %v1025_v4  ;;  %v1058_v9 = vld [vmem:[#allocation2 + $0x38] sm:$0xff]   ;;  %v1061_v10 = vld [vmem:[#allocation2 + $0x40] sm:$0xff]   ;;  %v1067_v11 = vld [vmem:[#allocation2 + $0x48] sm:$0xff]   ;;  %vm525_vm7 = vcmask 1045504   ;;  %vm527_vm8 = vcmask 1046528   ;;  %s988_s0 = smov [#allocation5]  }
  0x17   :  { %756 = vmatprep.subr.bf16.mxu0 %v986_v0  ;;  %738 = vmatprep.subr.bf16.mxu1 %v986_v0  ;;  %v29_v14 = vld [vmem:[#allocation2 + $0x8] sm:$0x1]  ;;  %v69_v16 = vsub.s32 0, %v1076_v13  ;;  %s629_s1 = sshll.u32 %s988_s0, 4  ;;  %s630_s1 = int_to_ptr.vmem [resolvable:$true] %s629_s1 }
  0x18   :  { %v30_v15 = vunpack.c.l.bf16 %v29_v14  ;;  %s957_s25 = scalar_lea.vmem %s630_s1, 128  ;;  %p962_p9 = scmp.lt.s32.totalorder %s630_s1, %s630_s1 }
  0x19   :  { %733 = vmatmul.mubr.msk.bf16.vlgmr.msra.gmra.mrb[0].mxu0 %vm77_vm1, %v66_v3  ;;  %p958_p8 = scmp.ne.s32.totalorder %s630_s1, %s957_s25  ;;  %p963_p10 = scmp.lt.s32.totalorder %s957_s25, %s957_s25 }
  0x1a   :  { %757 = vmatpush3.bf16.msra.mxu0 %v1025_v4  ;;  %772 = vmatprep.mubr.msk.bf16.mxu0 %vm987_vm0, %v986_v0  ;;  %v70_v17 = vrot.slane %v30_v15, %v69_v16 }
  0x1b   :  { %758 = vmatprep.subr.bf16.mxu0 %v986_v0  ;;  %739 = vmatpush3.bf16.msra.mxu1 %v1029_v5  ;;  %p964_p11 = por %p963_p10, %p962_p9 }
  0x1c   :  { %740 = vmatprep.subr.bf16.mxu1 %v986_v0 }
  0x1d   :  { %p965_p12 = pnand %p964_p11, %p958_p8 }
  0x1e   :  { %759 = vmatpush3.bf16.msra.mxu0 %v1029_v5 }
  0x1f   :  { %760 = vmatprep.subr.bf16.mxu0 %v986_v0  ;;  %741 = vmatpush3.bf16.msra.mxu1 %v1032_v6 }
  0x20   :  { %742 = vmatprep.subr.bf16.mxu1 %v986_v0 }
  0x22   :  { %761 = vmatpush3.bf16.msra.mxu0 %v1032_v6 }
  0x23   :  { %762 = vmatprep.subr.bf16.mxu0 %v986_v0  ;;  %743 = vmatpush3.bf16.msra.mxu1 %v1040_v7 }
  0x24   :  { %744 = vmatprep.subr.bf16.mxu1 %v986_v0 }
  0x26   :  { %763 = vmatpush3.bf16.msra.mxu0 %v1040_v7 }
  0x27   :  { %764 = vmatprep.subr.bf16.mxu0 %v986_v0  ;;  %745 = vmatpush3.bf16.msra.mxu1 %v1052_v8 }
  0x28   :  { %746 = vmatprep.subr.bf16.mxu1 %v986_v0 }
  0x2a   :  { %765 = vmatpush3.bf16.msra.mxu0 %v1052_v8 }
  0x2b   :  { %766 = vmatprep.subr.bf16.mxu0 %v986_v0  ;;  %747 = vmatpush3.bf16.msra.mxu1 %v1058_v9 }
  0x2c   :  { %748 = vmatprep.subr.bf16.mxu1 %v986_v0 }
  0x2e   :  { %767 = vmatpush3.bf16.msra.mxu0 %v1058_v9 }
  0x2f   :  { %768 = vmatprep.subr.bf16.mxu0 %v986_v0  ;;  %749 = vmatpush3.bf16.msra.mxu1 %v1061_v10 }
  0x30   :  { %750 = vmatprep.subr.bf16.mxu1 %v986_v0 }
  0x32   :  { %769 = vmatpush3.bf16.msra.mxu0 %v1061_v10 }
  0x33   :  { %770 = vmatprep.subr.bf16.mxu0 %v986_v0  ;;  %751 = vmatpush3.bf16.msra.mxu1 %v1067_v11 }
  0x34   :  { %776 = vmatprep.subr.bf16.mxu1 %v986_v0 }
  0x36   :  { %771 = vmatpush3.bf16.msra.mxu0 %v1067_v11 }
  0x37   :  { %796 = vmatprep.subr.bf16.mxu0 %v986_v0 }
  0xec   :  { %v115_v18 = vpop.f32.mrb[0].mxu0 }
  0xed   :  { %v1081_v19 = vadd.f32 %v115_v18, %v70_v17  ;;  %v734_v20 = vpop.f32.mrb[1].mxu0  ;;  %v913_v18 = vld [vmem:[#allocation2 + $0x60] sm:$0xff]  }
  0xee   :  { %v118_v21 = vpop.f32.mrb[2].mxu0 }
  0xef   :  { %v735_v22 = vpop.f32.mrb[3].mxu0  ;;  %919 = vtanh.f32 %v1081_v19 }
  0xf9   :  { %v920_v23 = vpop.eup %919 }
  0xfa   :  { %v122_v24 = vpack.c.bf16 %v920_v23, %v920_v23 }
  0xfc   :  { %753 = vmatmul.mubr.bf16.vlgmr.msra.gmra.mrb[0].mxu1 %v122_v24 }
  0xfd   :  { %777 = vmatpush3.bf16.msra.mxu1 %v1025_v4  ;;  %792 = vmatprep.mubr.msk.bf16.mxu1 %vm987_vm0, %v986_v0 }
  0xfe   :  { %778 = vmatprep.subr.bf16.mxu1 %v986_v0 }
 0x101   :  { %779 = vmatpush3.bf16.msra.mxu1 %v1029_v5 }
 0x102   :  { %780 = vmatprep.subr.bf16.mxu1 %v986_v0 }
 0x105   :  { %781 = vmatpush3.bf16.msra.mxu1 %v1032_v6 }
 0x106   :  { %782 = vmatprep.subr.bf16.mxu1 %v986_v0 }
 0x109   :  { %783 = vmatpush3.bf16.msra.mxu1 %v1040_v7 }
 0x10a   :  { %784 = vmatprep.subr.bf16.mxu1 %v986_v0 }
 0x10d   :  { %785 = vmatpush3.bf16.msra.mxu1 %v1052_v8 }
 0x10e   :  { %786 = vmatprep.subr.bf16.mxu1 %v986_v0 }
 0x111   :  { %787 = vmatpush3.bf16.msra.mxu1 %v1058_v9 }
 0x112   :  { %788 = vmatprep.subr.bf16.mxu1 %v986_v0 }
 0x115   :  { %789 = vmatpush3.bf16.msra.mxu1 %v1061_v10 }
 0x116   :  { %790 = vmatprep.subr.bf16.mxu1 %v986_v0 }
 0x119   :  { %791 = vmatpush3.bf16.msra.mxu1 %v1067_v11 }
 0x11a   :  { %816 = vmatprep.subr.bf16.mxu1 %v986_v0 }
 0x1cf   :  { %v205_v25 = vpop.f32.mrb[0].mxu1 }
 0x1d0   :  { %v212_v26 = vrot.slane %v205_v25, 7  ;;  %v754_v27 = vpop.f32.mrb[1].mxu1 }
 0x1d1   :  { %v208_v28 = vpop.f32.mrb[2].mxu1 }
 0x1d2   :  { %v214_v29 = vadd.f32 %v212_v26, %v1081_v19  ;;  %v755_v30 = vpop.f32.mrb[3].mxu1 }
 0x1d3   :  { %v914_v30 = vld [vmem:[#allocation2 + $0x68] sm:$0xff]  }
 0x1d4   :  { %921 = vtanh.f32 %v214_v29 }
 0x1de   :  { %v922_v31 = vpop.eup %921 }
 0x1df   :  { %v216_v32 = vpack.c.bf16 %v922_v31, %v922_v31  ;;  %v516_v41 = vsel %vm515_vm2, %v920_v23, %v922_v31  ;;  %v915_v31 = vld [vmem:[#allocation2 + $0x70] sm:$0xff]  }
 0x1e1   :  { %v218_v33 = vshrl.u32 %v216_v32, 16  ;;  %v916_v32 = vld [vmem:[#allocation2 + $0x78] sm:$0xff]  }
 0x1e3   :  { %773 = vmatmul.mubr.bf16.vlgmr.msra.gmra.mrb[4].mxu0 %v218_v33  ;;  %v917_v33 = vld [vmem:[#allocation2 + $0x80] sm:$0xff]  }
 0x1e4   :  { %797 = vmatpush3.bf16.msra.mxu0 %v1025_v4  ;;  %812 = vmatprep.mubr.msk.bf16.mxu0 %vm987_vm0, %v986_v0 }
 0x1e5   :  { %798 = vmatprep.subr.bf16.mxu0 %v986_v0 }
 0x1e8   :  { %799 = vmatpush3.bf16.msra.mxu0 %v1029_v5 }
 0x1e9   :  { %800 = vmatprep.subr.bf16.mxu0 %v986_v0 }
 0x1ec   :  { %801 = vmatpush3.bf16.msra.mxu0 %v1032_v6 }
 0x1ed   :  { %802 = vmatprep.subr.bf16.mxu0 %v986_v0 }
 0x1f0   :  { %803 = vmatpush3.bf16.msra.mxu0 %v1040_v7 }
 0x1f1   :  { %804 = vmatprep.subr.bf16.mxu0 %v986_v0 }
 0x1f4   :  { %805 = vmatpush3.bf16.msra.mxu0 %v1052_v8 }
 0x1f5   :  { %806 = vmatprep.subr.bf16.mxu0 %v986_v0 }
 0x1f8   :  { %807 = vmatpush3.bf16.msra.mxu0 %v1058_v9 }
 0x1f9   :  { %808 = vmatprep.subr.bf16.mxu0 %v986_v0 }
 0x1fc   :  { %809 = vmatpush3.bf16.msra.mxu0 %v1061_v10 }
 0x1fd   :  { %810 = vmatprep.subr.bf16.mxu0 %v986_v0 }
 0x200   :  { %811 = vmatpush3.bf16.msra.mxu0 %v1067_v11 }
 0x201   :  { %836 = vmatprep.subr.bf16.mxu0 %v986_v0 }
 0x2b6   :  { %v255_v34 = vpop.f32.mrb[4].mxu0 }
 0x2b7   :  { %v262_v35 = vrot.slane %v255_v34, 6  ;;  %v774_v36 = vpop.f32.mrb[5].mxu0  ;;  %v918_v34 = vld [vmem:[#allocation2 + $0x88] sm:$0xff]  }
 0x2b8   :  { %v258_v37 = vpop.f32.mrb[6].mxu0 }
 0x2b9   :  { %v264_v38 = vadd.f32 %v262_v35, %v1081_v19  ;;  %v775_v39 = vpop.f32.mrb[7].mxu0 }
 0x2bb   :  { %923 = vtanh.f32 %v264_v38 }
 0x2c5   :  { %v924_v40 = vpop.eup %923 }
 0x2c6   :  { %v266_v42 = vpack.c.bf16 %v924_v40, %v924_v40  ;;  %v518_v43 = vsel %vm517_vm3, %v516_v41, %v924_v40 }
 0x2c8   :  { %v268_v44 = vrot.slane %v266_v42, 1 }
 0x2ca   :  { %793 = vmatmul.mubr.bf16.vlgmr.msra.gmra.mrb[4].mxu1 %v268_v44  ;;  %v63_v44 = vld [vmem:[#allocation2 + $0x90] sm:$0x1] }
 0x2cb   :  { %817 = vmatpush3.bf16.msra.mxu1 %v1025_v4  ;;  %832 = vmatprep.mubr.msk.bf16.mxu1 %vm987_vm0, %v986_v0 }
 0x2cc   :  { %818 = vmatprep.subr.bf16.mxu1 %v986_v0 }
 0x2cf   :  { %819 = vmatpush3.bf16.msra.mxu1 %v1029_v5 }
 0x2d0   :  { %820 = vmatprep.subr.bf16.mxu1 %v986_v0 }
 0x2d3   :  { %821 = vmatpush3.bf16.msra.mxu1 %v1032_v6 }
 0x2d4   :  { %822 = vmatprep.subr.bf16.mxu1 %v986_v0 }
 0x2d7   :  { %823 = vmatpush3.bf16.msra.mxu1 %v1040_v7 }
 0x2d8   :  { %824 = vmatprep.subr.bf16.mxu1 %v986_v0 }
 0x2db   :  { %825 = vmatpush3.bf16.msra.mxu1 %v1052_v8 }
 0x2dc   :  { %826 = vmatprep.subr.bf16.mxu1 %v986_v0 }
 0x2df   :  { %827 = vmatpush3.bf16.msra.mxu1 %v1058_v9 }
 0x2e0   :  { %828 = vmatprep.subr.bf16.mxu1 %v986_v0 }
 0x2e3   :  { %829 = vmatpush3.bf16.msra.mxu1 %v1061_v10 }
 0x2e4   :  { %830 = vmatprep.subr.bf16.mxu1 %v986_v0 }
 0x2e7   :  { %831 = vmatpush3.bf16.msra.mxu1 %v1067_v11 }
 0x2e8   :  { %856 = vmatprep.subr.bf16.mxu1 %v986_v0 }
 0x39d   :  { %v304_v45 = vpop.f32.mrb[4].mxu1 }
 0x39e   :  { %v311_v46 = vrot.slane %v304_v45, 5  ;;  %v794_v47 = vpop.f32.mrb[5].mxu1  ;;  %v64_v45 = vunpack.c.l.bf16 %v63_v44 }
 0x39f   :  { %v307_v48 = vpop.f32.mrb[6].mxu1 }
 0x3a0   :  { %v313_v49 = vadd.f32 %v311_v46, %v1081_v19  ;;  %v795_v50 = vpop.f32.mrb[7].mxu1  ;;  %v533_v46 = vrot.slane %v64_v45, %v69_v16 }
 0x3a2   :  { %925 = vtanh.f32 %v313_v49 }
 0x3ac   :  { %v926_v51 = vpop.eup %925 }
 0x3ad   :  { %v315_v52 = vpack.c.bf16 %v926_v51, %v926_v51  ;;  %v520_v53 = vsel %vm519_vm4, %v518_v43, %v926_v51 }
 0x3af   :  { %v317_v54 = vshrl.u32 %v315_v52, 16 }
 0x3b1   :  { %v319_v55 = vrot.slane %v317_v54, 1 }
 0x3b3   :  { %813 = vmatmul.mubr.bf16.vlgmr.msra.gmra.mrb[8].mxu0 %v319_v55 }
 0x3b4   :  { %837 = vmatpush3.bf16.msra.mxu0 %v1025_v4  ;;  %852 = vmatprep.mubr.msk.bf16.mxu0 %vm987_vm0, %v986_v0 }
 0x3b5   :  { %838 = vmatprep.subr.bf16.mxu0 %v986_v0 }
 0x3b8   :  { %839 = vmatpush3.bf16.msra.mxu0 %v1029_v5 }
 0x3b9   :  { %840 = vmatprep.subr.bf16.mxu0 %v986_v0 }
 0x3bc   :  { %841 = vmatpush3.bf16.msra.mxu0 %v1032_v6 }
 0x3bd   :  { %842 = vmatprep.subr.bf16.mxu0 %v986_v0 }
 0x3c0   :  { %843 = vmatpush3.bf16.msra.mxu0 %v1040_v7 }
 0x3c1   :  { %844 = vmatprep.subr.bf16.mxu0 %v986_v0 }
 0x3c4   :  { %845 = vmatpush3.bf16.msra.mxu0 %v1052_v8 }
 0x3c5   :  { %846 = vmatprep.subr.bf16.mxu0 %v986_v0 }
 0x3c8   :  { %847 = vmatpush3.bf16.msra.mxu0 %v1058_v9 }
 0x3c9   :  { %848 = vmatprep.subr.bf16.mxu0 %v986_v0 }
 0x3cc   :  { %849 = vmatpush3.bf16.msra.mxu0 %v1061_v10 }
 0x3cd   :  { %850 = vmatprep.subr.bf16.mxu0 %v986_v0 }
 0x3d0   :  { %851 = vmatpush3.bf16.msra.mxu0 %v1067_v11 }
 0x3d1   :  { %876 = vmatprep.subr.bf16.mxu0 %v986_v0 }
 0x486   :  { %v355_v56 = vpop.f32.mrb[8].mxu0 }
 0x487   :  { %v362_v57 = vrot.slane %v355_v56, 4  ;;  %v814_v58 = vpop.f32.mrb[9].mxu0 }
 0x488   :  { %v358_v59 = vpop.f32.mrb[10].mxu0 }
 0x489   :  { %v364_v60 = vadd.f32 %v362_v57, %v1081_v19  ;;  %v815_v61 = vpop.f32.mrb[11].mxu0 }
 0x48b   :  { %927 = vtanh.f32 %v364_v60 }
 0x495   :  { %v928_v62 = vpop.eup %927 }
 0x496   :  { %v366_v63 = vpack.c.bf16 %v928_v62, %v928_v62  ;;  %v522_v1 = vsel %vm521_vm5, %v520_v53, %v928_v62 }
 0x498   :  { %v368_v2 = vrot.slane %v366_v63, 2 }
 0x49a   :  { %833 = vmatmul.mubr.bf16.vlgmr.msra.gmra.mrb[8].mxu1 %v368_v2 }
 0x49b   :  { %857 = vmatpush3.bf16.msra.mxu1 %v1025_v4  ;;  %872 = vmatprep.mubr.msk.bf16.mxu1 %vm987_vm0, %v986_v0 }
 0x49c   :  { %858 = vmatprep.subr.bf16.mxu1 %v986_v0 }
 0x49f   :  { %859 = vmatpush3.bf16.msra.mxu1 %v1029_v5 }
 0x4a0   :  { %860 = vmatprep.subr.bf16.mxu1 %v986_v0 }
 0x4a3   :  { %861 = vmatpush3.bf16.msra.mxu1 %v1032_v6 }
 0x4a4   :  { %862 = vmatprep.subr.bf16.mxu1 %v986_v0 }
 0x4a7   :  { %863 = vmatpush3.bf16.msra.mxu1 %v1040_v7 }
 0x4a8   :  { %864 = vmatprep.subr.bf16.mxu1 %v986_v0 }
 0x4ab   :  { %865 = vmatpush3.bf16.msra.mxu1 %v1052_v8 }
 0x4ac   :  { %866 = vmatprep.subr.bf16.mxu1 %v986_v0 }
 0x4af   :  { %867 = vmatpush3.bf16.msra.mxu1 %v1058_v9 }
 0x4b0   :  { %868 = vmatprep.subr.bf16.mxu1 %v986_v0 }
 0x4b3   :  { %869 = vmatpush3.bf16.msra.mxu1 %v1061_v10  ;;  %v911_v10 = vld [vmem:[#allocation2 + $0x50] sm:$0xff]  }
 0x4b4   :  { %870 = vmatprep.subr.bf16.mxu1 %v986_v0 }
 0x4b7   :  { %871 = vmatpush3.bf16.msra.mxu1 %v1067_v11  ;;  %v912_v11 = vld [vmem:[#allocation2 + $0x58] sm:$0xff]  }
 0x56d   :  { %v404_v3 = vpop.f32.mrb[8].mxu1 }
 0x56e   :  { %v411_v4 = vrot.slane %v404_v3, 3  ;;  %v834_v5 = vpop.f32.mrb[9].mxu1 }
 0x56f   :  { %v407_v6 = vpop.f32.mrb[10].mxu1 }
 0x570   :  { %v413_v7 = vadd.f32 %v411_v4, %v1081_v19  ;;  %v835_v12 = vpop.f32.mrb[11].mxu1 }
 0x572   :  { %929 = vtanh.f32 %v413_v7 }
 0x57c   :  { %v930_v8 = vpop.eup %929 }
 0x57d   :  { %v415_v14 = vpack.c.bf16 %v930_v8, %v930_v8  ;;  %v524_v9 = vsel %vm523_vm6, %v522_v1, %v930_v8 }
 0x57f   :  { %v417_v15 = vshrl.u32 %v415_v14, 16 }
 0x581   :  { %v419_v17 = vrot.slane %v417_v15, 2 }
 0x583   :  { %853 = vmatmul.mubr.bf16.vlgmr.msra.gmra.mrb[12].mxu0 %v419_v17 }
 0x584   :  { %892 = vmatprep.mubr.msk.bf16.mxu0 %vm987_vm0, %v986_v0  ;;  %877 = vmatpush3.bf16.msra.mxu0 %v911_v10 }
 0x585   :  { %878 = vmatprep.subr.bf16.mxu0 %v986_v0 }
 0x588   :  { %879 = vmatpush3.bf16.msra.mxu0 %v912_v11 }
 0x589   :  { %880 = vmatprep.subr.bf16.mxu0 %v986_v0 }
 0x58c   :  { %881 = vmatpush3.bf16.msra.mxu0 %v913_v18 }
 0x58d   :  { %882 = vmatprep.subr.bf16.mxu0 %v986_v0 }
 0x590   :  { %883 = vmatpush3.bf16.msra.mxu0 %v914_v30 }
 0x591   :  { %884 = vmatprep.subr.bf16.mxu0 %v986_v0 }
 0x594   :  { %885 = vmatpush3.bf16.msra.mxu0 %v915_v31 }
 0x595   :  { %886 = vmatprep.subr.bf16.mxu0 %v986_v0 }
 0x598   :  { %887 = vmatpush3.bf16.msra.mxu0 %v916_v32 }
 0x599   :  { %888 = vmatprep.subr.bf16.mxu0 %v986_v0 }
 0x59c   :  { %889 = vmatpush3.bf16.msra.mxu0 %v917_v33 }
 0x59d   :  { %890 = vmatprep.subr.bf16.mxu0 %v986_v0 }
 0x5a0   :  { %891 = vmatpush3.bf16.msra.mxu0 %v918_v34 }
 0x656   :  { %v455_v20 = vpop.f32.mrb[12].mxu0 }
 0x657   :  { %v462_v21 = vrot.slane %v455_v20, 2  ;;  %v854_v22 = vpop.f32.mrb[13].mxu0 }
 0x658   :  { %v458_v23 = vpop.f32.mrb[14].mxu0 }
 0x659   :  { %v464_v24 = vadd.f32 %v462_v21, %v1081_v19  ;;  %v855_v25 = vpop.f32.mrb[15].mxu0 }
 0x65b   :  { %931 = vtanh.f32 %v464_v24 }
 0x665   :  { %v932_v26 = vpop.eup %931 }
 0x666   :  { %v466_v27 = vpack.c.bf16 %v932_v26, %v932_v26  ;;  %v526_v28 = vsel %vm525_vm7, %v524_v9, %v932_v26 }
 0x668   :  { %v468_v29 = vrot.slane %v466_v27, 3 }
 0x66a   :  { %873 = vmatmul.mubr.bf16.vlgmr.msra.gmra.mrb[12].mxu1 %v468_v29 }
 0x73d   :  { %v504_v35 = vpop.f32.mrb[12].mxu1 }
 0x73e   :  { %v511_v36 = vrot.slane %v504_v35, 1  ;;  %v874_v37 = vpop.f32.mrb[13].mxu1 }
 0x73f   :  { %v507_v38 = vpop.f32.mrb[14].mxu1 }
 0x740   :  { %v513_v39 = vadd.f32 %v511_v36, %v1081_v19  ;;  %v875_v40 = vpop.f32.mrb[15].mxu1 }
 0x742   :  { %933 = vtanh.f32 %v513_v39 }
 0x74c   :  { %v934_v41 = vpop.eup %933 }
 0x74d   :  { %v528_v42 = vsel %vm527_vm8, %v526_v28, %v934_v41 }
 0x74e   :  { %v529_v43 = vpack.c.bf16 %v528_v42, %v528_v42 }
 0x750   :  { %893 = vmatmul.mubr.bf16.vlgmr.msra.gmra.mrb[16].mxu0 %v529_v43 }
 0x823   :  { %v616_v0 = vpop.f32.mrb[16].mxu0 }
 0x824   :  { %v617_v47 = vadd.f32 %v616_v0, %v533_v46  ;;  %v894_v48 = vpop.f32.mrb[17].mxu0 }
 0x825   :  { %v619_v49 = vpop.f32.mrb[18].mxu0 }
 0x826   :  { %622 = vst [vmem:[#allocation5] sm:$0xff] %v617_v47  ;;  %v895_v19 = vpop.f32.mrb[19].mxu0 }
 0x827   :  { %968 = shalt.err (!%p965_p12)
}
 0x828   :  { %s969_s28 = scalar_lea.hbm %s1205_s2, 128 }
 0x829   :  { %p970_p13 = scmp.ne.s32.totalorder %s1205_s2, %s969_s28  ;;  %p973_p0 = scmp.lt.u32.totalorder %s969_s28, %s1205_s2 }
 0x82b   :  { %p975_p1 = pnand %p973_p0, %p970_p13 }
 0x82d   :  { %978 = shalt.err (!%p975_p1)
}
 0x82e   :  { %632 = dma.vmem_to_hbm [thread:$0]  %s630_s1, 128, %s1205_s2, [#allocation4]  }
 0x82f   :  { %981 = dma.done.wait [#allocation4], 128  }
 0x830   :  { %982 = vsyncadd [#allocation4], 4294967168 }
 0x831   :  { %636 = vsyncpa [#allocation3], 1 }
 0x832   :  { %637 = vsyncpa [#allocation4], 1 }

</bundles_post_ra>
